<compile_context>
chip_gen: v6e
topology: v6e:2x2x1
jax: 0.10.0
libtpu: 0.0.40
codegen_flags: <defaults>
</compile_context>

<pallas_src>
import functools

import numpy as np
import jax
import jax.numpy as jnp
from jax.experimental import pallas as pl
from jax.experimental.pallas import tpu as pltpu


# ---------------------------------------------------------------------------
# Pallas kernels
# ---------------------------------------------------------------------------

def _matmul_bias_act_kernel(a_ref, b_ref, bias_ref, o_ref, acc_ref, *, relu):
    """Tiled matmul with fused bias + optional ReLU epilogue.

    grid = (M/tm, N/tn, K/tk); K is the sequential reduction axis.
      a_ref    : [tm, tk]  bf16
      b_ref    : [tk, tn]  bf16
      bias_ref : [1,  tn]  f32
      o_ref    : [tm, tn]
      acc_ref  : [tm, tn]  f32 VMEM scratch (persists across the K axis)
    """
    k = pl.program_id(2)

    @pl.when(k == 0)
    def _():
        acc_ref[...] = jnp.zeros_like(acc_ref)

    acc_ref[...] += jnp.dot(a_ref[...], b_ref[...],
                            preferred_element_type=jnp.float32)

    @pl.when(k == pl.num_programs(2) - 1)
    def _():
        r = acc_ref[...] + bias_ref[...]
        if relu:
            r = jnp.maximum(r, 0.0)
        o_ref[...] = r.astype(o_ref.dtype)


def matmul_bias_act(a, b, bias, *, relu, out_dtype):
    """a: [M, K] bf16, b: [K, N] bf16, bias: [1, N] f32; shapes already tile-padded."""
    M, K = a.shape
    _, N = b.shape
    tm = 256 if M % 256 == 0 else (128 if M % 128 == 0 else M)
    tn = 512 if N % 512 == 0 else (256 if N % 256 == 0 else 128)
    tk = 512
    grid = (M // tm, N // tn, K // tk)
    kernel = functools.partial(_matmul_bias_act_kernel, relu=relu)
    return pl.pallas_call(
        kernel,
        out_shape=jax.ShapeDtypeStruct((M, N), out_dtype),
        grid_spec=pltpu.PrefetchScalarGridSpec(
            num_scalar_prefetch=0,
            grid=grid,
            in_specs=[
                pl.BlockSpec((tm, tk), lambda i, j, k: (i, k)),
                pl.BlockSpec((tk, tn), lambda i, j, k: (k, j)),
                pl.BlockSpec((1, tn), lambda i, j, k: (0, j)),
            ],
            out_specs=pl.BlockSpec((tm, tn), lambda i, j, k: (i, j)),
            scratch_shapes=[pltpu.VMEM((tm, tn), jnp.float32)],
        ),
        compiler_params=pltpu.CompilerParams(
            dimension_semantics=("parallel", "parallel", "arbitrary")),
    )(a, b, bias)


def _max4_kernel(a_ref, b_ref, c_ref, d_ref, o_ref):
    o_ref[...] = jnp.maximum(jnp.maximum(a_ref[...], b_ref[...]),
                             jnp.maximum(c_ref[...], d_ref[...]))


def maxpool2x2(x):
    """x: [B, H, W, C] NHWC with even H, W. 2x2 max pool, stride 2."""
    a = x[:, 0::2, 0::2, :]
    b = x[:, 0::2, 1::2, :]
    c = x[:, 1::2, 0::2, :]
    d = x[:, 1::2, 1::2, :]
    return pl.pallas_call(
        _max4_kernel,
        out_shape=jax.ShapeDtypeStruct(a.shape, x.dtype),
        in_specs=[pl.BlockSpec(memory_space=pltpu.MemorySpace.VMEM)] * 4,
        out_specs=pl.BlockSpec(memory_space=pltpu.MemorySpace.VMEM),
    )(a, b, c, d)


# ---------------------------------------------------------------------------
# Conv layer = im2col (wrapper glue) + Pallas matmul (all the FLOPs)
# ---------------------------------------------------------------------------

def _round_up(x, m):
    return (x + m - 1) // m * m


def conv2d(x, w, bias, *, padding, relu, out_dtype=jnp.bfloat16):
    """x: [B, H, W, Cin] ; w: [kh, kw, Cin, Cout] HWIO ; bias: [Cout]. Stride 1."""
    B, H, W, _ = x.shape
    kh, kw, cin, cout = w.shape
    ph, pw = padding
    xp = jnp.pad(x, ((0, 0), (ph, ph), (pw, pw), (0, 0)))
    Ho = H + 2 * ph - kh + 1
    Wo = W + 2 * pw - kw + 1

    # im2col: feature index ordered (i, j, c), matching w.reshape(kh*kw*cin, cout).
    cols = [xp[:, i:i + Ho, j:j + Wo, :] for i in range(kh) for j in range(kw)]
    patches = jnp.concatenate(cols, axis=-1)                 # [B, Ho, Wo, kh*kw*Cin]

    M, K, N = B * Ho * Wo, kh * kw * cin, cout
    a = patches.reshape(M, K).astype(jnp.bfloat16)
    b2 = w.reshape(K, N).astype(jnp.bfloat16)

    # Pad to MXU / lane friendly tile multiples (zero padding leaves the matmul unchanged).
    Mp = _round_up(M, 8)
    Kp = _round_up(K, 512)
    Np = _round_up(N, 128)
    a = jnp.pad(a, ((0, Mp - M), (0, Kp - K)))
    b2 = jnp.pad(b2, ((0, Kp - K), (0, Np - N)))
    bb = jnp.pad(bias.astype(jnp.float32), (0, Np - N)).reshape(1, Np)

    out = matmul_bias_act(a, b2, bb, relu=relu, out_dtype=out_dtype)
    return out[:M, :N].reshape(B, Ho, Wo, N)


# ---------------------------------------------------------------------------
# ImageModule: VGG-16 features + fc7 / fc8 full-conv head
# ---------------------------------------------------------------------------

VGG16_CFG = [64, 64, "M", 128, 128, "M", 256, 256, 256, "M",
             512, 512, 512, "M", 512, 512, 512, "M"]


def build_arch():
    layers = []
    cin = 3
    for v in VGG16_CFG:
        if v == "M":
            layers.append(("pool", None))
        else:
            layers.append(("conv", (3, 3, cin, v, (1, 1), True)))
            cin = v
    # vgg_fc7_full_conv: 7x7 pad(3,3) 512->4096 + ReLU, then 1x1 4096->4096 + ReLU
    layers.append(("conv", (7, 7, 512, 4096, (3, 3), True)))
    layers.append(("conv", (1, 1, 4096, 4096, (0, 0), True)))
    # vgg_fc8_full_conv: 1x1 4096->1000, no ReLU
    layers.append(("conv", (1, 1, 4096, 1000, (0, 0), False)))
    return layers


def init_params(key, layers):
    weights = []
    for kind, cfg in layers:
        if kind == "pool":
            weights.append(None)
            continue
        kh, kw, ci, co, _, _ = cfg
        key, k_w, k_b = jax.random.split(key, 3)
        scale = float(np.sqrt(2.0 / (kh * kw * ci)))         # He init (keeps activations finite)
        w = jax.random.normal(k_w, (kh, kw, ci, co), jnp.bfloat16) * scale
        b = jax.random.normal(k_b, (co,), jnp.float32) * 0.01
        weights.append((w, b))
    return weights


def image_module_forward(x_nchw, layers, weights):
    """x_nchw: [B, 3, H, W] float32. Returns [B, 1000, H/32, W/32] (NCHW), like PyTorch."""
    x = jnp.transpose(x_nchw, (0, 2, 3, 1)).astype(jnp.bfloat16)   # NCHW -> NHWC
    n_conv = sum(1 for k, _ in layers if k == "conv")
    conv_i = 0
    for (kind, cfg), wgt in zip(layers, weights):
        if kind == "pool":
            x = maxpool2x2(x)
        else:
            conv_i += 1
            kh, kw, ci, co, pad, relu = cfg
            out_dtype = jnp.float32 if conv_i == n_conv else jnp.bfloat16
            w, b = wgt
            x = conv2d(x, w, b, padding=pad, relu=relu, out_dtype=out_dtype)
    return jnp.transpose(x, (0, 3, 1, 2))                          # NHWC -> NCHW


# ---------------------------------------------------------------------------
# main
# ---------------------------------------------------------------------------

if __name__ == "__main__":
    key = jax.random.PRNGKey(0)
    pkey, dkey = jax.random.split(key)

    layers = build_arch()
    weights = init_params(pkey, layers)

    # Smallest spatial size that survives VGG-16's five 2x2 max-pools (32 -> 1).
    B, C, S = 2, 3, 32
    x = jax.random.normal(dkey, (B, C, S, S), jnp.float32)

    out = image_module_forward(x, layers, weights)
    out = jax.block_until_ready(out)

    assert out.shape == (B, 1000, 1, 1), out.shape
    assert bool(jnp.all(jnp.isfinite(out)))
    print("KERNEL_OK")
</pallas_src>

<mosaic_0001>
module attributes {stable_mosaic.version = 11 : i64} {
  func.func @_matmul_bias_act_kernel(%arg0: i32, %arg1: i32, %arg2: i32, %arg3: memref<256x512xbf16, #tpu.memory_space<vmem>>, %arg4: memref<512x128xbf16, #tpu.memory_space<vmem>>, %arg5: memref<1x128xf32, #tpu.memory_space<vmem>>, %arg6: memref<256x128xbf16, #tpu.memory_space<vmem>>, %arg7: memref<256x128xf32, #tpu.memory_space<vmem>>) attributes {dimension_semantics = [#tpu.dimension_semantics<parallel>, #tpu.dimension_semantics<parallel>, #tpu.dimension_semantics<arbitrary>], iteration_bounds = array<i64: 8, 1, 1>, scalar_prefetch = 0 : i64, scratch_operands = 1 : i64, tpu.core_type = #tpu.core_type<tc>, window_params = [{transform_indices = @transform_0, window_bounds = array<i64: 256, 512>}, {transform_indices = @transform_1, window_bounds = array<i64: 512, 128>}, {transform_indices = @transform_2, window_bounds = array<i64: 1, 128>}, {transform_indices = @transform_3, window_bounds = array<i64: 256, 128>}]} {
    %c0_i32 = arith.constant 0 : i32
    %0 = arith.cmpi eq, %arg2, %c0_i32 : i32
    %1 = arith.extui %0 : i1 to i32
    %c0_i32_0 = arith.constant 0 : i32
    %2 = arith.cmpi ne, %1, %c0_i32_0 : i32
    scf.if %2 {
      %cst_10 = arith.constant 0.000000e+00 : f32
      %12 = vector.broadcast %cst_10 : f32 to vector<256x128xf32>
      %c0_11 = arith.constant 0 : index
      %c0_12 = arith.constant 0 : index
      %13 = vector.load %arg7[%c0_11, %c0_12] : memref<256x128xf32, #tpu.memory_space<vmem>>, vector<256x128xf32>
      tpu.vector_store %arg7[%c0_11, %c0_12], %12 {strides = array<i32>} : memref<256x128xf32, #tpu.memory_space<vmem>>, vector<256x128xf32>,
    } else {
    }
    %c0 = arith.constant 0 : index
    %c0_1 = arith.constant 0 : index
    %3 = vector.load %arg7[%c0, %c0_1] : memref<256x128xf32, #tpu.memory_space<vmem>>, vector<256x128xf32>
    %c0_2 = arith.constant 0 : index
    %c0_3 = arith.constant 0 : index
    %4 = vector.load %arg3[%c0_2, %c0_3] : memref<256x512xbf16, #tpu.memory_space<vmem>>, vector<256x512xbf16>
    %c0_4 = arith.constant 0 : index
    %c0_5 = arith.constant 0 : index
    %5 = vector.load %arg4[%c0_4, %c0_5] : memref<512x128xbf16, #tpu.memory_space<vmem>>, vector<512x128xbf16>
    %cst = arith.constant dense<0.000000e+00> : vector<256x128xf32>
    %6 = tpu.matmul %4, %5, %cst {dimension_numbers = #tpu.dot_dimension_numbers<[1], [0], [0], [1], [0, 0, 1, 1], [], []>} : vector<256x512xbf16>, vector<512x128xbf16>, vector<256x128xf32> -> vector<256x128xf32>
    %7 = arith.addf %3, %6 : vector<256x128xf32>
    %c0_6 = arith.constant 0 : index
    %c0_7 = arith.constant 0 : index
    %8 = vector.load %arg7[%c0_6, %c0_7] : memref<256x128xf32, #tpu.memory_space<vmem>>, vector<256x128xf32>
    tpu.vector_store %arg7[%c0_6, %c0_7], %7 {strides = array<i32>} : memref<256x128xf32, #tpu.memory_space<vmem>>, vector<256x128xf32>,
    %c0_i32_8 = arith.constant 0 : i32
    %9 = arith.cmpi eq, %arg2, %c0_i32_8 : i32
    %10 = arith.extui %9 : i1 to i32
    %c0_i32_9 = arith.constant 0 : i32
    %11 = arith.cmpi ne, %10, %c0_i32_9 : i32
    scf.if %11 {
      %c0_10 = arith.constant 0 : index
      %c0_11 = arith.constant 0 : index
      %12 = vector.load %arg7[%c0_10, %c0_11] : memref<256x128xf32, #tpu.memory_space<vmem>>, vector<256x128xf32>
      %c0_12 = arith.constant 0 : index
      %c0_13 = arith.constant 0 : index
      %13 = vector.load %arg5[%c0_12, %c0_13] : memref<1x128xf32, #tpu.memory_space<vmem>>, vector<1x128xf32>
      %14 = vector.broadcast %13 : vector<1x128xf32> to vector<256x128xf32>
      %15 = arith.addf %12, %14 : vector<256x128xf32>
      %cst_14 = arith.constant 0.000000e+00 : f32
      %16 = vector.broadcast %cst_14 : f32 to vector<256x128xf32>
      %17 = arith.maximumf %15, %16 : vector<256x128xf32>
      %18 = arith.truncf %17 : vector<256x128xf32> to vector<256x128xbf16>
      %c0_15 = arith.constant 0 : index
      %c0_16 = arith.constant 0 : index
      %19 = vector.load %arg6[%c0_15, %c0_16] : memref<256x128xbf16, #tpu.memory_space<vmem>>, vector<256x128xbf16>
      tpu.vector_store %arg6[%c0_15, %c0_16], %18 {strides = array<i32>} : memref<256x128xbf16, #tpu.memory_space<vmem>>, vector<256x128xbf16>,
    } else {
    }
    return
  }
  func.func @transform_0(%arg0: i32, %arg1: i32, %arg2: i32) -> (i32, i32) {
    %c0_i32 = arith.constant 0 : i32
    return %arg0, %arg2 : i32, i32
  }
  func.func @transform_1(%arg0: i32, %arg1: i32, %arg2: i32) -> (i32, i32) {
    %c0_i32 = arith.constant 0 : i32
    return %arg2, %arg1 : i32, i32
  }
  func.func @transform_2(%arg0: i32, %arg1: i32, %arg2: i32) -> (i32, i32) {
    %c0_i32 = arith.constant 0 : i32
    %c0_i32_0 = arith.constant 0 : i32
    return %c0_i32, %arg1 : i32, i32
  }
  func.func @transform_3(%arg0: i32, %arg1: i32, %arg2: i32) -> (i32, i32) {
    %c0_i32 = arith.constant 0 : i32
    return %arg0, %arg1 : i32, i32
  }
}

</mosaic_0001>

<bundles_post_ra>
// kernel: tpu_custom_call.1
= control target key start
LH: loop header
LB: loop body
LE: loop exit
PB: predicated region body
PF: predicated region fallthrough
CT: control target
= control target key end

     0   :  { %8 = vsyncpa [#allocation4], 0  ;;  %s2976_s0 = inlined_call_operand.hbm [shape: bf16[2048,512], index: 0, kind: input, shape index: {}]   ;;  %s2977_s1 = inlined_call_operand.hbm [shape: bf16[512,128], index: 1, kind: input, shape index: {}]   ;;  %s2978_s2 = inlined_call_operand.hbm [shape: f32[1,128], index: 2, kind: input, shape index: {}]   ;;  %s2979_s3 = inlined_call_operand.hbm [shape: bf16[2048,128], index: 3, kind: output, shape index: {}]  }
   0x1   :  { %10 = vsyncpa [#allocation4 + $0x1], 0 }
   0x2   :  { %11 = vsyncpa [#allocation7], 0 }
   0x3   :  { %12 = vsyncpa [#allocation5], 0 }
   0x4   :  { %14 = vsyncpa [#allocation5 + $0x1], 0  ;;  %s2670_s12 = smov 0   ;;  %s2672_s13 = smov 0  }
   0x5   :  { %s2674_s14 = smov 0   ;;  %s2676_s15 = smov 0  }
   0x6   :  { %s2678_s16 = smov 0   ;;  %s2680_s17 = smov 0  }
   0x7 LB: > { %s1754_s18 = sadd.s32 4294967295, %s2638_s17   ;;  %s1755_s19 = sadd.s32 4294967294, %s2638_s17   ;;  %s2638_s17 = sphi %s2680_s17, %s20_s17   ;;  %s2634_s16 = sphi %s2678_s16, %s2996_s16   ;;  %s2630_s15 = sphi %s2676_s15, %s2995_s15   ;;  %s2626_s14 = sphi %s2674_s14, %s2994_s14   ;;  %s2622_s13 = sphi %s2672_s13, %s2993_s13   ;;  %s2618_s12 = sphi %s2670_s12, %s2992_s12  }
   0x8   : > { %p61_p0 = scmp.ne.s32.totalorder %s2622_s13, %s2618_s12  ;;  %p2704_p1 = scmp.eq.s32.totalorder %s1754_s18, 0 }
   0x9   : > { %p2708_p2 = scmp.eq.s32.totalorder %s1754_s18, 7  ;;  %p147_p3 = scmp.eq.s32.totalorder %s1755_s19, 7 }
   0xa   : > { %s2982_s20 = scalar_select %p2704_p1, 1, 0 }
   0xb   : > { %p2714_p4 = por %p2704_p1, %p61_p0  ;;  %p1756_p5 = scmp.ge.s32.totalorder %s2638_s17, 1 }
   0xc   : > { %p2719_p6 = por %p147_p3, %p61_p0  ;;  %p154_p7 = scmp.lt.s32.totalorder %s2638_s17, 9 }
   0xd   : > { %s2640_s25 = smov [#allocation6]   ;;  %s2641_s28 = smov [#allocation8]  }
   0xe   : > { %s2985_s23 = scalar_select %p2719_p6, 1, 0 }
   0xf   : > { %p2724_p8 = pnand %p1756_p5, %p154_p7  ;;  %s170_s26 = sshll.u32 %s2640_s25, 4  ;;  %s171_s26 = int_to_ptr.vmem [resolvable:$true] %s170_s26 }
  0x10   : > { %s186_s29 = sshll.u32 %s2641_s28, 4  ;;  %s2485_s30 = scalar_lea.vmem %s171_s26, 4096  ;;  %s187_s29 = int_to_ptr.vmem [resolvable:$true] %s186_s29 }
  0x11   : > { %p2269_p9 = pneg %p2724_p8  ;;  %p2486_p12 = scmp.ne.s32.totalorder %s171_s26, %s2485_s30 }
  0x12   : > { %p2493_p3 = scmp.lt.s32.totalorder %s171_s26, %s171_s26  ;;  %p2494_p5 = scmp.lt.s32.totalorder %s2485_s30, %s2485_s30 }
  0x13   : > { %p2732_p10 = pnand %p2269_p9, %p2704_p1 }
  0x14   : > { %p2495_p7 = por %p2494_p5, %p2493_p3 }
  0x15   : > { %p2476_p11 = pneg %p2732_p10 }
  0x17   : > { %p2488_p13 = pnand %p2486_p12, %p2476_p11 }
  0x19   : > { %p2489_p0 = pneg %p2488_p13 }
  0x1b   : > { %p2496_p9 = pnand %p2495_p7, %p2489_p0 }
  0x1d   : > { %2499 = shalt.err (!%p2496_p9)
}
  0x1e   : > { %s2642_s4 = smov 64   ;;  %s2643_s5 = smov 4  }
  0x1f   : > { %2272 = dma.hbm_to_vmem [thread:$0]  (!%p2732_p10), %s2977_s1, 4096, %s171_s26, [#allocation7], %s2642_s4, %s2642_s4, %s2643_s5  }
  0x20   : > { %s2511_s8 = scalar_lea.vmem %s187_s29, 16  ;;  %s2518_s9 = scalar_lea.vmem %s187_s29, 32 }
  0x21   : > { %p2512_p6 = scmp.ne.s32.totalorder %s187_s29, %s2511_s8  ;;  %p2519_p1 = scmp.lt.s32.totalorder %s187_s29, %s187_s29 }
  0x22   : > { %p2520_p3 = scmp.lt.s32.totalorder %s2518_s9, %s2511_s8 }
  0x23   : > { %p2514_p12 = pnand %p2512_p6, %p2476_p11 }
  0x24   : > { %p2521_p0 = por %p2520_p3, %p2519_p1 }
  0x25   : > { %p2515_p13 = pneg %p2514_p12 }
  0x27   : > { %p2522_p5 = pnand %p2521_p0, %p2515_p13 }
  0x29   : > { %2525 = shalt.err (!%p2522_p5)
}
  0x2a   : > { %2275 = dma.hbm_to_vmem [thread:$0]  (!%p2732_p10), %s2978_s2, 16, %s187_s29, [#allocation7]  }
  0x2b   : > { %s39_s18 = sadd.s32 1, %s2634_s16  ;;  %s48_s19 = sadd.s32 1, %s2626_s14 }
  0x2c   : > { %p41_p1 = scmp.ge.s32.totalorder %s39_s18, 8  ;;  %p55_p6 = scmp.ne.s32.totalorder %s2626_s14, %s2622_s13 }
  0x2d   : > { %p56_p11 = scmp.eq.s32.totalorder %s2638_s17, 0  ;;  %p2286_p7 = scmp.lt.s32.totalorder %s2638_s17, 8 }
  0x2e   : > { %s2998_s18 = smov (%p41_p1, %s39_s18), 0  ;;  %p2764_p12 = por %p2708_p2, %p55_p6 }
  0x2f   : > { %p57_p9 = por %p56_p11, %p55_p6  ;;  %s43_s26 = ssub.s32 %s2634_s16, %s2998_s18 }
  0x30   : > { %s197_s27 = sand.u32 1, %s2626_s14   ;;  %p46_p13 = scmp.eq.s32.totalorder %s43_s26, 0 }
  0x31   : > { %s1760_s28 = sshll.u32 %s197_s27, 9  ;;  %s1904_s29 = sshll.u32 %s2634_s16, 13 }
  0x32   : > { %s2773_s30 = scalar_select %p46_p13, %s2626_s14, %s48_s19  }
  0x33   : > { %s210_s6 = scalar_lea.hbm %s2976_s0, %s1904_s29  ;;  %s201_s7 = scalar_lea.vmem [#allocation3], %s1760_s28 }
  0x34   : > { %s211_s8 = sshll.u32 %s201_s7, 4  ;;  %p2780_p10 = pnand %p2286_p7, %p57_p9  ;;  %s212_s8 = int_to_ptr.vmem [resolvable:$true] %s211_s8 }
  0x35   : > { %s198_s9 = scalar_lea.sflag [#allocation4], %s197_s27  ;;  %s2539_s10 = scalar_lea.vmem %s212_s8, 8192 }
  0x36   : > { %p2528_p2 = pneg %p2780_p10  ;;  %p2540_p3 = scmp.ne.s32.totalorder %s212_s8, %s2539_s10 }
  0x37   : > { %s2644_s11 = smov [#allocation3]  }
  0x38   : > { %p2542_p0 = pnand %p2540_p3, %p2528_p2  ;;  %s2544_s19 = sshll.u32 %s2644_s11, 4  ;;  %s2545_s19 = int_to_ptr.vmem [resolvable:$false] %s2544_s19 }
  0x39   : > { %s2546_s26 = scalar_lea.vmem %s2545_s19, 16384  ;;  %p2547_p1 = scmp.lt.s32.totalorder %s212_s8, %s2545_s19 }
  0x3a   : > { %p2543_p5 = pneg %p2542_p0  ;;  %p2548_p6 = scmp.lt.s32.totalorder %s2546_s26, %s2539_s10 }
  0x3c   : > { %p2549_p11 = por %p2548_p6, %p2547_p1 }
  0x3e   : > { %p2550_p7 = pnand %p2549_p11, %p2543_p5 }
  0x40   : > { %2553 = shalt.err (!%p2550_p7)
}
  0x41   : > { %s2645_s28 = smov 256   ;;  %s2646_s29 = smov 16  }
  0x42   : > { %2279 = dma.hbm_to_vmem [thread:$0]  (!%p2780_p10), %s210_s6, 8192, %s212_s8, %s198_s9, %s2645_s28, %s2645_s28, %s2646_s29  }
  0x43   : > { %223 = sbr.rel (%p2724_p8) target bundleno = 454 (0x1c6), region = 32  ;;  %s2791_s27 = sand.u32 (!%p2724_p8), 1, %s2622_s13  }
  0x44   : > { %s1765_s4 = sshll.u32 (!%p2724_p8), %s2791_s27, 9  ;;  %s226_s5 = scalar_lea.sflag (!%p2724_p8), [#allocation4], %s2791_s27 }
  0x45   : > { %s2795_s7 = scalar_lea.vmem (!%p2724_p8), [#allocation3], %s1765_s4 }
  0x48   : > { %2605 = dma.done.wait (%p2714_p4), %s226_s5, 8192  }
  0x49   : > { %2607 = vsyncadd (%p2714_p4), %s226_s5, 4294959104  ;;  %p2990_p9 = scmp.ne.s32.totalorder %s2982_s20, 0 }
  0x4b   : > { %2609 = dma.done.wait (%p2990_p9), [#allocation7], 4112  }
  0x4c   : > { %2611 = vsyncadd (%p2990_p9), [#allocation7], 4294963184  ;;  %v2346_v0 = vld [vmem:[#allocation6 + $0x78] sm:$0xff]   ;;  %v2350_v4 = vld [vmem:[#allocation6 + $0x70] sm:$0xff]   ;;  %s1768_s20 = sshll.u32 %s2791_s27, 7  ;;  %s1937_s24 = sshll.u32 %s2630_s15, 11 }
  0x4d   : > { %v2347_v1 = vld [vmem:[#allocation6 + $0xf8] sm:$0xff]   ;;  %2033 = vmatprep.subr.bf16.mxu0 %v2346_v0  ;;  %v2351_v5 = vld [vmem:[#allocation6 + $0xf0] sm:$0xff]   ;;  %v2354_v8 = vld [vmem:[#allocation6 + $0x68] sm:$0xff]   ;;  %s2874_s22 = scalar_lea.vmem [#allocation9], %s1768_s20  ;;  %s2926_s9 = scalar_lea.hbm %s2979_s3, %s1937_s24 }
  0x4e   : > { %v2348_v2 = vld [vmem:[#allocation6 + $0x38] sm:$0xff]   ;;  %2145 = vmatprep.subr.bf16.mxu1 %v2347_v1  ;;  %v2352_v6 = vld [vmem:[#allocation6 + $0x30] sm:$0xff]   ;;  %v2355_v9 = vld [vmem:[#allocation6 + $0xe8] sm:$0xff]   ;;  %s1640_s6 = sshll.u32 %s2874_s22, 4  ;;  %s1626_s10 = scalar_lea.sflag [#allocation5], %s2791_s27  ;;  %s2928_s6 = int_to_ptr.vmem [resolvable:$true] %s1640_s6 }
  0x4f   : > { %v2349_v3 = vld [vmem:[#allocation6 + $0xb8] sm:$0xff]   ;;  %2034 = vmatpush3.bf16.msra.mxu0 %v2348_v2  ;;  %v2353_v7 = vld [vmem:[#allocation6 + $0xb0] sm:$0xff]   ;;  %v2356_v10 = vld [vmem:[#allocation6 + $0x28] sm:$0xff]   ;;  %s2554_s11 = scalar_lea.vmem %s2928_s6, 2048  ;;  %s2647_s15 = smov [#allocation9]  }
  0x50   : > { %2146 = vmatpush3.bf16.msra.mxu1 %v2349_v3  ;;  %2035 = vmatprep.subr.bf16.mxu0 %v2350_v4  ;;  %v2357_v11 = vld [vmem:[#allocation6 + $0xa8] sm:$0xff]   ;;  %v2358_v12 = vld [vmem:[#allocation6 + $0x60] sm:$0xff]   ;;  %v2362_v16 = vld [vmem:[#allocation6 + $0x58] sm:$0xff]   ;;  %p2555_p4 = scmp.ne.s32.totalorder %s2928_s6, %s2554_s11  ;;  %s2558_s19 = sshll.u32 %s2647_s15, 4  ;;  %s2559_s19 = int_to_ptr.vmem [resolvable:$false] %s2558_s19 }
  0x51   : > { %2147 = vmatprep.subr.bf16.mxu1 %v2351_v5  ;;  %v2359_v13 = vld [vmem:[#allocation6 + $0xe0] sm:$0xff]   ;;  %v2363_v17 = vld [vmem:[#allocation6 + $0xd8] sm:$0xff]   ;;  %v2366_v20 = vld [vmem:[#allocation6 + $0x50] sm:$0xff]   ;;  %s2560_s26 = scalar_lea.vmem %s2559_s19, 4096  ;;  %p2561_p10 = scmp.lt.s32.totalorder %s2928_s6, %s2559_s19 }
  0x52   : > { %v2360_v14 = vld [vmem:[#allocation6 + $0x20] sm:$0xff]   ;;  %v2364_v18 = vld [vmem:[#allocation6 + $0x18] sm:$0xff]   ;;  %v2367_v21 = vld [vmem:[#allocation6 + $0xd0] sm:$0xff]   ;;  %p2556_p8 = pnand %p2555_p4, %p2764_p12  ;;  %p2562_p2 = scmp.lt.s32.totalorder %s2560_s26, %s2554_s11 }
  0x53   : > { %2036 = vmatpush3.bf16.msra.mxu0 %v2352_v6  ;;  %v2361_v15 = vld [vmem:[#allocation6 + $0xa0] sm:$0xff]   ;;  %v2365_v19 = vld [vmem:[#allocation6 + $0x98] sm:$0xff]   ;;  %v2368_v22 = vld [vmem:[#allocation6 + $0x10] sm:$0xff]  }
  0x54   : > { %2148 = vmatpush3.bf16.msra.mxu1 %v2353_v7  ;;  %2037 = vmatprep.subr.bf16.mxu0 %v2354_v8  ;;  %v2369_v23 = vld [vmem:[#allocation6 + $0x90] sm:$0xff]   ;;  %v2370_v24 = vld [vmem:[#allocation6 + $0x48] sm:$0xff]   ;;  %v2374_v28 = vld [vmem:[#allocation6 + $0x40] sm:$0xff]   ;;  %p2557_p13 = pneg %p2556_p8  ;;  %p2563_p3 = por %p2562_p2, %p2561_p10 }
  0x55   : > { %2149 = vmatprep.subr.bf16.mxu1 %v2355_v9  ;;  %v2371_v25 = vld [vmem:[#allocation6 + $0xc8] sm:$0xff]   ;;  %v2375_v29 = vld [vmem:[#allocation6 + $0xc0] sm:$0xff]  }
  0x56   : > { %v2372_v26 = vld [vmem:[#allocation6 + $0x8] sm:$0xff]   ;;  %v2376_v30 = vld [vmem:[#allocation6] sm:$0xff]   ;;  %p2564_p0 = pnand %p2563_p3, %p2557_p13 }
  0x57   : > { %2038 = vmatpush3.bf16.msra.mxu0 %v2356_v10  ;;  %v2373_v27 = vld [vmem:[#allocation6 + $0x88] sm:$0xff]   ;;  %v2377_v31 = vld [vmem:[#allocation6 + $0x80] sm:$0xff]  }
  0x58   : > { %2150 = vmatpush3.bf16.msra.mxu1 %v2357_v11  ;;  %2039 = vmatprep.subr.bf16.mxu0 %v2358_v12  ;;  %v2378_v32 = vld [vmem:[%s2795_s7] ss:$16 sps:$4 sm:$0xff]   ;;  %v2380_v33 = vld [vmem:[%s2795_s7 + $0x4] ss:$16 sps:$4 sm:$0xff]   ;;  %v2381_v34 = vld [vmem:[%s2795_s7 + $0x8] ss:$16 sps:$4 sm:$0xff]  }
  0x59   : > { %2151 = vmatprep.subr.bf16.mxu1 %v2359_v13  ;;  %v2383_v35 = vld [vmem:[%s2795_s7 + $0xc] ss:$16 sps:$4 sm:$0xff]   ;;  %1005 = vmatprep.mubr.bf16.mxu0 %v2380_v33  ;;  %v2384_v36 = vld [vmem:[%s2795_s7 + $0x24] ss:$16 sps:$4 sm:$0xff]   ;;  %v2388_v38 = vld [vmem:[%s2795_s7 + $0x20] ss:$16 sps:$4 sm:$0xff]  }
  0x5a   : > { %1166 = vmatprep.mubr.bf16.mxu1 %v2383_v35  ;;  %v2386_v37 = vld [vmem:[%s2795_s7 + $0x2c] ss:$16 sps:$4 sm:$0xff]   ;;  %v2389_v39 = vld [vmem:[%s2795_s7 + $0x28] ss:$16 sps:$4 sm:$0xff]   ;;  %v2390_v40 = vld [vmem:[%s2795_s7 + $0x44] ss:$16 sps:$4 sm:$0xff]  }
  0x5b   : > { %2040 = vmatpush3.bf16.msra.mxu0 %v2360_v14  ;;  %v2392_v41 = vld [vmem:[%s2795_s7 + $0x4c] ss:$16 sps:$4 sm:$0xff]   ;;  %v2394_v42 = vld [vmem:[%s2795_s7 + $0x40] ss:$16 sps:$4 sm:$0xff]   ;;  %v2395_v43 = vld [vmem:[%s2795_s7 + $0x48] ss:$16 sps:$4 sm:$0xff]  }
  0x5c   : > { %2152 = vmatpush3.bf16.msra.mxu1 %v2361_v15  ;;  %2041 = vmatprep.subr.bf16.mxu0 %v2362_v16  ;;  %v2396_v44 = vld [vmem:[%s2795_s7 + $0x64] ss:$16 sps:$4 sm:$0xff]   ;;  %v2398_v45 = vld [vmem:[%s2795_s7 + $0x6c] ss:$16 sps:$4 sm:$0xff]   ;;  %v2400_v46 = vld [vmem:[%s2795_s7 + $0x60] ss:$16 sps:$4 sm:$0xff]  }
  0x5d   : > { %2153 = vmatprep.subr.bf16.mxu1 %v2363_v17  ;;  %v2401_v47 = vld [vmem:[%s2795_s7 + $0x68] ss:$16 sps:$4 sm:$0xff]   ;;  %v2402_v48 = vld [vmem:[%s2795_s7 + $0x84] ss:$16 sps:$4 sm:$0xff]   ;;  %v2404_v49 = vld [vmem:[%s2795_s7 + $0x8c] ss:$16 sps:$4 sm:$0xff]  }
  0x5e   : > { %v2406_v50 = vld [vmem:[%s2795_s7 + $0x80] ss:$16 sps:$4 sm:$0xff]   ;;  %v2407_v51 = vld [vmem:[%s2795_s7 + $0x88] ss:$16 sps:$4 sm:$0xff]   ;;  %v2408_v52 = vld [vmem:[%s2795_s7 + $0xa4] ss:$16 sps:$4 sm:$0xff]  }
  0x5f   : > { %2042 = vmatpush3.bf16.msra.mxu0 %v2364_v18  ;;  %v2410_v53 = vld [vmem:[%s2795_s7 + $0xac] ss:$16 sps:$4 sm:$0xff]   ;;  %v2412_v54 = vld [vmem:[%s2795_s7 + $0xa0] ss:$16 sps:$4 sm:$0xff]   ;;  %v2413_v55 = vld [vmem:[%s2795_s7 + $0xa8] ss:$16 sps:$4 sm:$0xff]  }
  0x60   : > { %2154 = vmatpush3.bf16.msra.mxu1 %v2365_v19  ;;  %2043 = vmatprep.subr.bf16.mxu0 %v2366_v20  ;;  %v2414_v56 = vld [vmem:[%s2795_s7 + $0xc4] ss:$16 sps:$4 sm:$0xff]   ;;  %v2416_v57 = vld [vmem:[%s2795_s7 + $0xcc] ss:$16 sps:$4 sm:$0xff]   ;;  %v2418_v58 = vld [vmem:[%s2795_s7 + $0xc0] ss:$16 sps:$4 sm:$0xff]  }
  0x61   : > { %2155 = vmatprep.subr.bf16.mxu1 %v2367_v21  ;;  %v2419_v59 = vld [vmem:[%s2795_s7 + $0xc8] ss:$16 sps:$4 sm:$0xff]   ;;  %v2420_v60 = vld [vmem:[%s2795_s7 + $0xe4] ss:$16 sps:$4 sm:$0xff]   ;;  %v2422_v61 = vld [vmem:[%s2795_s7 + $0xec] ss:$16 sps:$4 sm:$0xff]  }
  0x62   : > { %v2424_v62 = vld [vmem:[%s2795_s7 + $0xe0] ss:$16 sps:$4 sm:$0xff]   ;;  %v2425_v63 = vld [vmem:[%s2795_s7 + $0xe8] ss:$16 sps:$4 sm:$0xff]   ;;  %v2426_v0 = vld [vmem:[%s2795_s7 + $0x104] ss:$16 sps:$4 sm:$0xff]  }
  0x63   : > { %2044 = vmatpush3.bf16.msra.mxu0 %v2368_v22  ;;  %v2428_v1 = vld [vmem:[%s2795_s7 + $0x10c] ss:$16 sps:$4 sm:$0xff]   ;;  %v2430_v2 = vld [vmem:[%s2795_s7 + $0x100] ss:$16 sps:$4 sm:$0xff]   ;;  %v2431_v3 = vld [vmem:[%s2795_s7 + $0x108] ss:$16 sps:$4 sm:$0xff]  }
  0x64   : > { %2156 = vmatpush3.bf16.msra.mxu1 %v2369_v23  ;;  %2045 = vmatprep.subr.bf16.mxu0 %v2370_v24  ;;  %v2432_v4 = vld [vmem:[%s2795_s7 + $0x124] ss:$16 sps:$4 sm:$0xff]   ;;  %v2434_v5 = vld [vmem:[%s2795_s7 + $0x12c] ss:$16 sps:$4 sm:$0xff]   ;;  %v2436_v6 = vld [vmem:[%s2795_s7 + $0x120] ss:$16 sps:$4 sm:$0xff]  }
  0x65   : > { %2157 = vmatprep.subr.bf16.mxu1 %v2371_v25  ;;  %v2437_v7 = vld [vmem:[%s2795_s7 + $0x128] ss:$16 sps:$4 sm:$0xff]   ;;  %v2438_v8 = vld [vmem:[%s2795_s7 + $0x144] ss:$16 sps:$4 sm:$0xff]   ;;  %v2440_v9 = vld [vmem:[%s2795_s7 + $0x14c] ss:$16 sps:$4 sm:$0xff]  }
  0x66   : > { %v2442_v10 = vld [vmem:[%s2795_s7 + $0x140] ss:$16 sps:$4 sm:$0xff]   ;;  %v2443_v11 = vld [vmem:[%s2795_s7 + $0x148] ss:$16 sps:$4 sm:$0xff]   ;;  %v2444_v12 = vld [vmem:[%s2795_s7 + $0x164] ss:$16 sps:$4 sm:$0xff]  }
  0x67   : > { %2046 = vmatpush3.bf16.msra.mxu0 %v2372_v26  ;;  %v2446_v13 = vld [vmem:[%s2795_s7 + $0x16c] ss:$16 sps:$4 sm:$0xff]   ;;  %v2448_v14 = vld [vmem:[%s2795_s7 + $0x160] ss:$16 sps:$4 sm:$0xff]   ;;  %v2449_v15 = vld [vmem:[%s2795_s7 + $0x168] ss:$16 sps:$4 sm:$0xff]  }
  0x68   : > { %2158 = vmatpush3.bf16.msra.mxu1 %v2373_v27  ;;  %2047 = vmatprep.subr.bf16.mxu0 %v2374_v28  ;;  %v2450_v16 = vld [vmem:[%s2795_s7 + $0x184] ss:$16 sps:$4 sm:$0xff]   ;;  %v2452_v17 = vld [vmem:[%s2795_s7 + $0x18c] ss:$16 sps:$4 sm:$0xff]   ;;  %v2454_v18 = vld [vmem:[%s2795_s7 + $0x180] ss:$16 sps:$4 sm:$0xff]  }
  0x69   : > { %2159 = vmatprep.subr.bf16.mxu1 %v2375_v29  ;;  %v2455_v19 = vld [vmem:[%s2795_s7 + $0x188] ss:$16 sps:$4 sm:$0xff]   ;;  %v2456_v20 = vld [vmem:[%s2795_s7 + $0x1a4] ss:$16 sps:$4 sm:$0xff]   ;;  %v2458_v21 = vld [vmem:[%s2795_s7 + $0x1ac] ss:$16 sps:$4 sm:$0xff]  }
  0x6a   : > { %v2460_v22 = vld [vmem:[%s2795_s7 + $0x1a0] ss:$16 sps:$4 sm:$0xff]   ;;  %v2461_v23 = vld [vmem:[%s2795_s7 + $0x1a8] ss:$16 sps:$4 sm:$0xff]   ;;  %v2462_v24 = vld [vmem:[%s2795_s7 + $0x1c4] ss:$16 sps:$4 sm:$0xff]  }
  0x6b   : > { %2048 = vmatpush3.bf16.msra.mxu0 %v2376_v30  ;;  %v2464_v25 = vld [vmem:[%s2795_s7 + $0x1cc] ss:$16 sps:$4 sm:$0xff]   ;;  %v2466_v26 = vld [vmem:[%s2795_s7 + $0x1c0] ss:$16 sps:$4 sm:$0xff]   ;;  %v2467_v27 = vld [vmem:[%s2795_s7 + $0x1c8] ss:$16 sps:$4 sm:$0xff]  }
  0x6c   : > { %2160 = vmatpush3.bf16.msra.mxu1 %v2377_v31  ;;  %v2468_v28 = vld [vmem:[%s2795_s7 + $0x1e4] ss:$16 sps:$4 sm:$0xff]   ;;  %v2470_v29 = vld [vmem:[%s2795_s7 + $0x1ec] ss:$16 sps:$4 sm:$0xff]   ;;  %v2472_v30 = vld [vmem:[%s2795_s7 + $0x1e0] ss:$16 sps:$4 sm:$0xff]  }
  0x6d   : > { %v2473_v31 = vld [vmem:[%s2795_s7 + $0x1e8] ss:$16 sps:$4 sm:$0xff]  }
  0x6e   : > { %1006 = vmatmul.mubr.bf16.vlgmr.msra.gmra.mxu0 %v2378_v32 }
  0x6f   : > { %1167 = vmatmul.mubr.bf16.vlgmr.msra.gmra.mxu1 %v2381_v34  ;;  %1013 = vmatprep.mubr.bf16.mxu0 %v2384_v36 }
  0x70   : > { %1174 = vmatprep.mubr.bf16.mxu1 %v2386_v37 }
  0x76   : > { %1014 = vmatmul.mubr.bf16.gmra.mxu0 %v2388_v38 }
  0x77   : > { %1175 = vmatmul.mubr.bf16.gmra.mxu1 %v2389_v39  ;;  %1021 = vmatprep.mubr.bf16.mxu0 %v2390_v40 }
  0x78   : > { %1182 = vmatprep.mubr.bf16.mxu1 %v2392_v41 }
  0x7e   : > { %1022 = vmatmul.mubr.bf16.gmra.mxu0 %v2394_v42  ;;  %v2869_v42 = vld [vmem:[#allocation8] ss:$0 sm:$0xff] }
  0x7f   : > { %1183 = vmatmul.mubr.bf16.gmra.mxu1 %v2395_v43  ;;  %1029 = vmatprep.mubr.bf16.mxu0 %v2396_v44 }
  0x80   : > { %1190 = vmatprep.mubr.bf16.mxu1 %v2398_v45 }
  0x86   : > { %1030 = vmatmul.mubr.bf16.gmra.mxu0 %v2400_v46 }
  0x87   : > { %1191 = vmatmul.mubr.bf16.gmra.mxu1 %v2401_v47  ;;  %1037 = vmatprep.mubr.bf16.mxu0 %v2402_v48 }
  0x88   : > { %1198 = vmatprep.mubr.bf16.mxu1 %v2404_v49 }
  0x8e   : > { %1038 = vmatmul.mubr.bf16.gmra.mxu0 %v2406_v50 }
  0x8f   : > { %1199 = vmatmul.mubr.bf16.gmra.mxu1 %v2407_v51  ;;  %1045 = vmatprep.mubr.bf16.mxu0 %v2408_v52 }
  0x90   : > { %1206 = vmatprep.mubr.bf16.mxu1 %v2410_v53 }
  0x96   : > { %1046 = vmatmul.mubr.bf16.gmra.mxu0 %v2412_v54 }
  0x97   : > { %1207 = vmatmul.mubr.bf16.gmra.mxu1 %v2413_v55  ;;  %1053 = vmatprep.mubr.bf16.mxu0 %v2414_v56 }
  0x98   : > { %1214 = vmatprep.mubr.bf16.mxu1 %v2416_v57 }
  0x9e   : > { %1054 = vmatmul.mubr.bf16.gmra.mxu0 %v2418_v58 }
  0x9f   : > { %1215 = vmatmul.mubr.bf16.gmra.mxu1 %v2419_v59  ;;  %1061 = vmatprep.mubr.bf16.mxu0 %v2420_v60 }
  0xa0   : > { %1222 = vmatprep.mubr.bf16.mxu1 %v2422_v61 }
  0xa6   : > { %1062 = vmatmul.mubr.bf16.gmra.mxu0 %v2424_v62 }
  0xa7   : > { %1223 = vmatmul.mubr.bf16.gmra.mxu1 %v2425_v63  ;;  %1069 = vmatprep.mubr.bf16.mxu0 %v2426_v0 }
  0xa8   : > { %1230 = vmatprep.mubr.bf16.mxu1 %v2428_v1 }
  0xae   : > { %1070 = vmatmul.mubr.bf16.gmra.mxu0 %v2430_v2 }
  0xaf   : > { %1231 = vmatmul.mubr.bf16.gmra.mxu1 %v2431_v3  ;;  %1077 = vmatprep.mubr.bf16.mxu0 %v2432_v4 }
  0xb0   : > { %1238 = vmatprep.mubr.bf16.mxu1 %v2434_v5 }
  0xb6   : > { %1078 = vmatmul.mubr.bf16.gmra.mxu0 %v2436_v6 }
  0xb7   : > { %1239 = vmatmul.mubr.bf16.gmra.mxu1 %v2437_v7  ;;  %1085 = vmatprep.mubr.bf16.mxu0 %v2438_v8 }
  0xb8   : > { %1246 = vmatprep.mubr.bf16.mxu1 %v2440_v9 }
  0xbe   : > { %1086 = vmatmul.mubr.bf16.gmra.mxu0 %v2442_v10 }
  0xbf   : > { %1247 = vmatmul.mubr.bf16.gmra.mxu1 %v2443_v11  ;;  %1093 = vmatprep.mubr.bf16.mxu0 %v2444_v12 }
  0xc0   : > { %1254 = vmatprep.mubr.bf16.mxu1 %v2446_v13 }
  0xc6   : > { %1094 = vmatmul.mubr.bf16.gmra.mxu0 %v2448_v14 }
  0xc7   : > { %1255 = vmatmul.mubr.bf16.gmra.mxu1 %v2449_v15  ;;  %1101 = vmatprep.mubr.bf16.mxu0 %v2450_v16 }
  0xc8   : > { %1262 = vmatprep.mubr.bf16.mxu1 %v2452_v17 }
  0xce   : > { %1102 = vmatmul.mubr.bf16.gmra.mxu0 %v2454_v18 }
  0xcf   : > { %1263 = vmatmul.mubr.bf16.gmra.mxu1 %v2455_v19  ;;  %1109 = vmatprep.mubr.bf16.mxu0 %v2456_v20 }
  0xd0   : > { %1270 = vmatprep.mubr.bf16.mxu1 %v2458_v21 }
  0xd6   : > { %1110 = vmatmul.mubr.bf16.gmra.mxu0 %v2460_v22 }
  0xd7   : > { %1271 = vmatmul.mubr.bf16.gmra.mxu1 %v2461_v23  ;;  %1117 = vmatprep.mubr.bf16.mxu0 %v2462_v24 }
  0xd8   : > { %1278 = vmatprep.mubr.bf16.mxu1 %v2464_v25 }
  0xde   : > { %1118 = vmatmul.mubr.bf16.gmra.mxu0 %v2466_v26 }
  0xdf   : > { %1279 = vmatmul.mubr.bf16.gmra.mxu1 %v2467_v27  ;;  %1125 = vmatprep.mubr.bf16.mxu0 %v2468_v28 }
  0xe0   : > { %1286 = vmatprep.mubr.bf16.mxu1 %v2470_v29 }
  0xe6   : > { %1126 = vmatmul.mubr.bf16.gmra.mxu0 %v2472_v30 }
  0xe7   : > { %1287 = vmatmul.mubr.bf16.gmra.mxu1 %v2473_v31 }
 0x12e   : > { %v2049_v32 = vpop.f32.mrf.mxu0 }
 0x12f   : > { %v2161_v33 = vpop.f32.mrf.mxu1 }
 0x130   : > { %v2050_v34 = vpop.f32.mrf.mxu0 }
 0x131   : > { %v2051_v35 = vadd.f32 %v2050_v34, %v2049_v32  ;;  %v2162_v36 = vpop.f32.mrf.mxu1 }
 0x132   : > { %v2163_v37 = vadd.f32 %v2162_v36, %v2161_v33  ;;  %v2052_v38 = vpop.f32.mrf.mxu0 }
 0x133   : > { %v2164_v39 = vpop.f32.mrf.mxu1 }
 0x134   : > { %v1169_v40 = vadd.f32 %v2163_v37, %v2051_v35  ;;  %v2053_v41 = vpop.f32.mrf.mxu0 }
 0x135   : > { %v2054_v43 = vadd.f32 %v2053_v41, %v2052_v38  ;;  %v2165_v44 = vpop.f32.mrf.mxu1 }
 0x136   : > { %v2166_v45 = vadd.f32 %v2165_v44, %v2164_v39  ;;  %v2055_v46 = vpop.f32.mrf.mxu0  ;;  %v1401_v48 = vadd.f32 %v2869_v42, %v1169_v40 }
 0x137   : > { %v2167_v47 = vpop.f32.mrf.mxu1 }
 0x138   : > { %v1172_v49 = vadd.f32 %v2166_v45, %v2054_v43  ;;  %v2056_v50 = vpop.f32.mrf.mxu0  ;;  %v1433_v57 = vmax.f32 %v1401_v48, 0.0 }
 0x139   : > { %v2057_v51 = vadd.f32 %v2056_v50, %v2055_v46  ;;  %v2168_v52 = vpop.f32.mrf.mxu1 }
 0x13a   : > { %v1402_v53 = vadd.f32 %v2869_v42, %v1172_v49  ;;  %v2169_v54 = vadd.f32 %v2168_v52, %v2167_v47  ;;  %v2058_v55 = vpop.f32.mrf.mxu0 }
 0x13b   : > { %v2170_v56 = vpop.f32.mrf.mxu1 }
 0x13c   : > { %v1434_v58 = vmax.f32 %v1402_v53, 0.0  ;;  %v1177_v59 = vadd.f32 %v2169_v54, %v2057_v51  ;;  %v2059_v60 = vpop.f32.mrf.mxu0 }
 0x13d   : > { %v2060_v61 = vadd.f32 %v2059_v60, %v2058_v55  ;;  %v2171_v62 = vpop.f32.mrf.mxu1 }
 0x13e   : > { %v1941_v63 = vpack.c.bf16 %v1434_v58, %v1433_v57  ;;  %v2172_v0 = vadd.f32 %v2171_v62, %v2170_v56  ;;  %v2061_v1 = vpop.f32.mrf.mxu0  ;;  %v1403_v3 = vadd.f32 %v2869_v42, %v1177_v59 }
 0x13f   : > { %v2173_v2 = vpop.f32.mrf.mxu1 }
 0x140   : > { %1942 = vst [vmem:[%s2874_s22] sm:$0xff] %v1941_v63   ;;  %v1180_v4 = vadd.f32 %v2172_v0, %v2060_v61  ;;  %v2062_v5 = vpop.f32.mrf.mxu0  ;;  %v1435_v12 = vmax.f32 %v1403_v3, 0.0 }
 0x141   : > { %v2063_v6 = vadd.f32 %v2062_v5, %v2061_v1  ;;  %v2174_v7 = vpop.f32.mrf.mxu1 }
 0x142   : > { %v1404_v8 = vadd.f32 %v2869_v42, %v1180_v4  ;;  %v2175_v9 = vadd.f32 %v2174_v7, %v2173_v2  ;;  %v2064_v10 = vpop.f32.mrf.mxu0 }
 0x143   : > { %v2176_v11 = vpop.f32.mrf.mxu1 }
 0x144   : > { %v1436_v13 = vmax.f32 %v1404_v8, 0.0  ;;  %v1185_v14 = vadd.f32 %v2175_v9, %v2063_v6  ;;  %v2065_v15 = vpop.f32.mrf.mxu0 }
 0x145   : > { %v2066_v16 = vadd.f32 %v2065_v15, %v2064_v10  ;;  %v2177_v17 = vpop.f32.mrf.mxu1 }
 0x146   : > { %v1946_v18 = vpack.c.bf16 %v1436_v13, %v1435_v12  ;;  %v2178_v19 = vadd.f32 %v2177_v17, %v2176_v11  ;;  %v2067_v20 = vpop.f32.mrf.mxu0  ;;  %v1405_v22 = vadd.f32 %v2869_v42, %v1185_v14 }
 0x147   : > { %v2179_v21 = vpop.f32.mrf.mxu1 }
 0x148   : > { %2018 = vst [vmem:[%s2874_s22 + $0x8] sm:$0xff] %v1946_v18   ;;  %v1188_v23 = vadd.f32 %v2178_v19, %v2066_v16  ;;  %v2068_v24 = vpop.f32.mrf.mxu0  ;;  %v1437_v31 = vmax.f32 %v1405_v22, 0.0 }
 0x149   : > { %v2069_v25 = vadd.f32 %v2068_v24, %v2067_v20  ;;  %v2180_v26 = vpop.f32.mrf.mxu1 }
 0x14a   : > { %v1406_v27 = vadd.f32 %v2869_v42, %v1188_v23  ;;  %v2181_v28 = vadd.f32 %v2180_v26, %v2179_v21  ;;  %v2070_v29 = vpop.f32.mrf.mxu0 }
 0x14b   : > { %v2182_v30 = vpop.f32.mrf.mxu1 }
 0x14c   : > { %v1438_v32 = vmax.f32 %v1406_v27, 0.0  ;;  %v1193_v33 = vadd.f32 %v2181_v28, %v2069_v25  ;;  %v2071_v34 = vpop.f32.mrf.mxu0 }
 0x14d   : > { %v2072_v35 = vadd.f32 %v2071_v34, %v2070_v29  ;;  %v2183_v36 = vpop.f32.mrf.mxu1 }
 0x14e   : > { %v1951_v37 = vpack.c.bf16 %v1438_v32, %v1437_v31  ;;  %v2184_v38 = vadd.f32 %v2183_v36, %v2182_v30  ;;  %v2073_v39 = vpop.f32.mrf.mxu0  ;;  %v1407_v41 = vadd.f32 %v2869_v42, %v1193_v33 }
 0x14f   : > { %v2185_v40 = vpop.f32.mrf.mxu1 }
 0x150   : > { %2019 = vst [vmem:[%s2874_s22 + $0x10] sm:$0xff] %v1951_v37   ;;  %v1196_v43 = vadd.f32 %v2184_v38, %v2072_v35  ;;  %v2074_v44 = vpop.f32.mrf.mxu0  ;;  %v1439_v51 = vmax.f32 %v1407_v41, 0.0 }
 0x151   : > { %v2075_v45 = vadd.f32 %v2074_v44, %v2073_v39  ;;  %v2186_v46 = vpop.f32.mrf.mxu1 }
 0x152   : > { %v1408_v47 = vadd.f32 %v2869_v42, %v1196_v43  ;;  %v2187_v48 = vadd.f32 %v2186_v46, %v2185_v40  ;;  %v2076_v49 = vpop.f32.mrf.mxu0 }
 0x153   : > { %v2188_v50 = vpop.f32.mrf.mxu1 }
 0x154   : > { %v1440_v52 = vmax.f32 %v1408_v47, 0.0  ;;  %v1201_v53 = vadd.f32 %v2187_v48, %v2075_v45  ;;  %v2077_v54 = vpop.f32.mrf.mxu0 }
 0x155   : > { %v2078_v55 = vadd.f32 %v2077_v54, %v2076_v49  ;;  %v2189_v56 = vpop.f32.mrf.mxu1 }
 0x156   : > { %v1956_v57 = vpack.c.bf16 %v1440_v52, %v1439_v51  ;;  %v2190_v58 = vadd.f32 %v2189_v56, %v2188_v50  ;;  %v2079_v59 = vpop.f32.mrf.mxu0  ;;  %v1409_v61 = vadd.f32 %v2869_v42, %v1201_v53 }
 0x157   : > { %v2191_v60 = vpop.f32.mrf.mxu1 }
 0x158   : > { %2020 = vst [vmem:[%s2874_s22 + $0x18] sm:$0xff] %v1956_v57   ;;  %v1204_v62 = vadd.f32 %v2190_v58, %v2078_v55  ;;  %v2080_v63 = vpop.f32.mrf.mxu0  ;;  %v1441_v6 = vmax.f32 %v1409_v61, 0.0 }
 0x159   : > { %v2081_v0 = vadd.f32 %v2080_v63, %v2079_v59  ;;  %v2192_v1 = vpop.f32.mrf.mxu1 }
 0x15a   : > { %v1410_v2 = vadd.f32 %v2869_v42, %v1204_v62  ;;  %v2193_v3 = vadd.f32 %v2192_v1, %v2191_v60  ;;  %v2082_v4 = vpop.f32.mrf.mxu0 }
 0x15b   : > { %v2194_v5 = vpop.f32.mrf.mxu1 }
 0x15c   : > { %v1442_v7 = vmax.f32 %v1410_v2, 0.0  ;;  %v1209_v8 = vadd.f32 %v2193_v3, %v2081_v0  ;;  %v2083_v9 = vpop.f32.mrf.mxu0 }
 0x15d   : > { %v2084_v10 = vadd.f32 %v2083_v9, %v2082_v4  ;;  %v2195_v11 = vpop.f32.mrf.mxu1 }
 0x15e   : > { %v1961_v12 = vpack.c.bf16 %v1442_v7, %v1441_v6  ;;  %v2196_v13 = vadd.f32 %v2195_v11, %v2194_v5  ;;  %v2085_v14 = vpop.f32.mrf.mxu0  ;;  %v1411_v16 = vadd.f32 %v2869_v42, %v1209_v8 }
 0x15f   : > { %v2197_v15 = vpop.f32.mrf.mxu1 }
 0x160   : > { %2021 = vst [vmem:[%s2874_s22 + $0x20] sm:$0xff] %v1961_v12   ;;  %v1212_v17 = vadd.f32 %v2196_v13, %v2084_v10  ;;  %v2086_v18 = vpop.f32.mrf.mxu0  ;;  %v1443_v25 = vmax.f32 %v1411_v16, 0.0 }
 0x161   : > { %v2087_v19 = vadd.f32 %v2086_v18, %v2085_v14  ;;  %v2198_v20 = vpop.f32.mrf.mxu1 }
 0x162   : > { %v1412_v21 = vadd.f32 %v2869_v42, %v1212_v17  ;;  %v2199_v22 = vadd.f32 %v2198_v20, %v2197_v15  ;;  %v2088_v23 = vpop.f32.mrf.mxu0 }
 0x163   : > { %v2200_v24 = vpop.f32.mrf.mxu1 }
 0x164   : > { %v1444_v26 = vmax.f32 %v1412_v21, 0.0  ;;  %v1217_v27 = vadd.f32 %v2199_v22, %v2087_v19  ;;  %v2089_v28 = vpop.f32.mrf.mxu0 }
 0x165   : > { %v2090_v29 = vadd.f32 %v2089_v28, %v2088_v23  ;;  %v2201_v30 = vpop.f32.mrf.mxu1 }
 0x166   : > { %v1966_v31 = vpack.c.bf16 %v1444_v26, %v1443_v25  ;;  %v2202_v32 = vadd.f32 %v2201_v30, %v2200_v24  ;;  %v2091_v33 = vpop.f32.mrf.mxu0  ;;  %v1413_v35 = vadd.f32 %v2869_v42, %v1217_v27 }
 0x167   : > { %v2203_v34 = vpop.f32.mrf.mxu1 }
 0x168   : > { %2022 = vst [vmem:[%s2874_s22 + $0x28] sm:$0xff] %v1966_v31   ;;  %v1220_v36 = vadd.f32 %v2202_v32, %v2090_v29  ;;  %v2092_v37 = vpop.f32.mrf.mxu0  ;;  %v1445_v45 = vmax.f32 %v1413_v35, 0.0 }
 0x169   : > { %v2093_v38 = vadd.f32 %v2092_v37, %v2091_v33  ;;  %v2204_v39 = vpop.f32.mrf.mxu1 }
 0x16a   : > { %v1414_v40 = vadd.f32 %v2869_v42, %v1220_v36  ;;  %v2205_v41 = vadd.f32 %v2204_v39, %v2203_v34  ;;  %v2094_v43 = vpop.f32.mrf.mxu0 }
 0x16b   : > { %v2206_v44 = vpop.f32.mrf.mxu1 }
 0x16c   : > { %v1446_v46 = vmax.f32 %v1414_v40, 0.0  ;;  %v1225_v47 = vadd.f32 %v2205_v41, %v2093_v38  ;;  %v2095_v48 = vpop.f32.mrf.mxu0 }
 0x16d   : > { %v2096_v49 = vadd.f32 %v2095_v48, %v2094_v43  ;;  %v2207_v50 = vpop.f32.mrf.mxu1 }
 0x16e   : > { %v1971_v51 = vpack.c.bf16 %v1446_v46, %v1445_v45  ;;  %v2208_v52 = vadd.f32 %v2207_v50, %v2206_v44  ;;  %v2097_v53 = vpop.f32.mrf.mxu0  ;;  %v1415_v55 = vadd.f32 %v2869_v42, %v1225_v47 }
 0x16f   : > { %v2209_v54 = vpop.f32.mrf.mxu1 }
 0x170   : > { %2023 = vst [vmem:[%s2874_s22 + $0x30] sm:$0xff] %v1971_v51   ;;  %v1228_v56 = vadd.f32 %v2208_v52, %v2096_v49  ;;  %v2098_v57 = vpop.f32.mrf.mxu0  ;;  %v1447_v0 = vmax.f32 %v1415_v55, 0.0 }
 0x171   : > { %v2099_v58 = vadd.f32 %v2098_v57, %v2097_v53  ;;  %v2210_v59 = vpop.f32.mrf.mxu1 }
 0x172   : > { %v1416_v60 = vadd.f32 %v2869_v42, %v1228_v56  ;;  %v2211_v61 = vadd.f32 %v2210_v59, %v2209_v54  ;;  %v2100_v62 = vpop.f32.mrf.mxu0 }
 0x173   : > { %v2212_v63 = vpop.f32.mrf.mxu1 }
 0x174   : > { %v1448_v1 = vmax.f32 %v1416_v60, 0.0  ;;  %v1233_v2 = vadd.f32 %v2211_v61, %v2099_v58  ;;  %v2101_v3 = vpop.f32.mrf.mxu0 }
 0x175   : > { %v2102_v4 = vadd.f32 %v2101_v3, %v2100_v62  ;;  %v2213_v5 = vpop.f32.mrf.mxu1 }
 0x176   : > { %v1976_v6 = vpack.c.bf16 %v1448_v1, %v1447_v0  ;;  %v2214_v7 = vadd.f32 %v2213_v5, %v2212_v63  ;;  %v2103_v8 = vpop.f32.mrf.mxu0  ;;  %v1417_v10 = vadd.f32 %v2869_v42, %v1233_v2 }
 0x177   : > { %v2215_v9 = vpop.f32.mrf.mxu1 }
 0x178   : > { %2024 = vst [vmem:[%s2874_s22 + $0x38] sm:$0xff] %v1976_v6   ;;  %v1236_v11 = vadd.f32 %v2214_v7, %v2102_v4  ;;  %v2104_v12 = vpop.f32.mrf.mxu0  ;;  %v1449_v19 = vmax.f32 %v1417_v10, 0.0 }
 0x179   : > { %v2105_v13 = vadd.f32 %v2104_v12, %v2103_v8  ;;  %v2216_v14 = vpop.f32.mrf.mxu1 }
 0x17a   : > { %v1418_v15 = vadd.f32 %v2869_v42, %v1236_v11  ;;  %v2217_v16 = vadd.f32 %v2216_v14, %v2215_v9  ;;  %v2106_v17 = vpop.f32.mrf.mxu0 }
 0x17b   : > { %v2218_v18 = vpop.f32.mrf.mxu1 }
 0x17c   : > { %v1450_v20 = vmax.f32 %v1418_v15, 0.0  ;;  %v1241_v21 = vadd.f32 %v2217_v16, %v2105_v13  ;;  %v2107_v22 = vpop.f32.mrf.mxu0 }
 0x17d   : > { %v2108_v23 = vadd.f32 %v2107_v22, %v2106_v17  ;;  %v2219_v24 = vpop.f32.mrf.mxu1 }
 0x17e   : > { %v1981_v25 = vpack.c.bf16 %v1450_v20, %v1449_v19  ;;  %v2220_v26 = vadd.f32 %v2219_v24, %v2218_v18  ;;  %v2109_v27 = vpop.f32.mrf.mxu0  ;;  %v1419_v29 = vadd.f32 %v2869_v42, %v1241_v21 }
 0x17f   : > { %v2221_v28 = vpop.f32.mrf.mxu1 }
 0x180   : > { %2025 = vst [vmem:[%s2874_s22 + $0x40] sm:$0xff] %v1981_v25   ;;  %v1244_v30 = vadd.f32 %v2220_v26, %v2108_v23  ;;  %v2110_v31 = vpop.f32.mrf.mxu0  ;;  %v1451_v38 = vmax.f32 %v1419_v29, 0.0 }
 0x181   : > { %v2111_v32 = vadd.f32 %v2110_v31, %v2109_v27  ;;  %v2222_v33 = vpop.f32.mrf.mxu1 }
 0x182   : > { %v1420_v34 = vadd.f32 %v2869_v42, %v1244_v30  ;;  %v2223_v35 = vadd.f32 %v2222_v33, %v2221_v28  ;;  %v2112_v36 = vpop.f32.mrf.mxu0 }
 0x183   : > { %v2224_v37 = vpop.f32.mrf.mxu1 }
 0x184   : > { %v1452_v39 = vmax.f32 %v1420_v34, 0.0  ;;  %v1249_v40 = vadd.f32 %v2223_v35, %v2111_v32  ;;  %v2113_v41 = vpop.f32.mrf.mxu0 }
 0x185   : > { %v2114_v43 = vadd.f32 %v2113_v41, %v2112_v36  ;;  %v2225_v44 = vpop.f32.mrf.mxu1 }
 0x186   : > { %v1986_v45 = vpack.c.bf16 %v1452_v39, %v1451_v38  ;;  %v2226_v46 = vadd.f32 %v2225_v44, %v2224_v37  ;;  %v2115_v47 = vpop.f32.mrf.mxu0  ;;  %v1421_v49 = vadd.f32 %v2869_v42, %v1249_v40 }
 0x187   : > { %v2227_v48 = vpop.f32.mrf.mxu1 }
 0x188   : > { %2026 = vst [vmem:[%s2874_s22 + $0x48] sm:$0xff] %v1986_v45   ;;  %v1252_v50 = vadd.f32 %v2226_v46, %v2114_v43  ;;  %v2116_v51 = vpop.f32.mrf.mxu0  ;;  %v1453_v58 = vmax.f32 %v1421_v49, 0.0 }
 0x189   : > { %v2117_v52 = vadd.f32 %v2116_v51, %v2115_v47  ;;  %v2228_v53 = vpop.f32.mrf.mxu1 }
 0x18a   : > { %v1422_v54 = vadd.f32 %v2869_v42, %v1252_v50  ;;  %v2229_v55 = vadd.f32 %v2228_v53, %v2227_v48  ;;  %v2118_v56 = vpop.f32.mrf.mxu0 }
 0x18b   : > { %v2230_v57 = vpop.f32.mrf.mxu1 }
 0x18c   : > { %v1454_v59 = vmax.f32 %v1422_v54, 0.0  ;;  %v1257_v60 = vadd.f32 %v2229_v55, %v2117_v52  ;;  %v2119_v61 = vpop.f32.mrf.mxu0 }
 0x18d   : > { %v2120_v62 = vadd.f32 %v2119_v61, %v2118_v56  ;;  %v2231_v63 = vpop.f32.mrf.mxu1 }
 0x18e   : > { %v1991_v0 = vpack.c.bf16 %v1454_v59, %v1453_v58  ;;  %v2232_v1 = vadd.f32 %v2231_v63, %v2230_v57  ;;  %v2121_v2 = vpop.f32.mrf.mxu0  ;;  %v1423_v4 = vadd.f32 %v2869_v42, %v1257_v60 }
 0x18f   : > { %v2233_v3 = vpop.f32.mrf.mxu1 }
 0x190   : > { %2027 = vst [vmem:[%s2874_s22 + $0x50] sm:$0xff] %v1991_v0   ;;  %v1260_v5 = vadd.f32 %v2232_v1, %v2120_v62  ;;  %v2122_v6 = vpop.f32.mrf.mxu0  ;;  %v1455_v13 = vmax.f32 %v1423_v4, 0.0 }
 0x191   : > { %v2123_v7 = vadd.f32 %v2122_v6, %v2121_v2  ;;  %v2234_v8 = vpop.f32.mrf.mxu1 }
 0x192   : > { %v1424_v9 = vadd.f32 %v2869_v42, %v1260_v5  ;;  %v2235_v10 = vadd.f32 %v2234_v8, %v2233_v3  ;;  %v2124_v11 = vpop.f32.mrf.mxu0 }
 0x193   : > { %v2236_v12 = vpop.f32.mrf.mxu1 }
 0x194   : > { %v1456_v14 = vmax.f32 %v1424_v9, 0.0  ;;  %v1265_v15 = vadd.f32 %v2235_v10, %v2123_v7  ;;  %v2125_v16 = vpop.f32.mrf.mxu0 }
 0x195   : > { %v2126_v17 = vadd.f32 %v2125_v16, %v2124_v11  ;;  %v2237_v18 = vpop.f32.mrf.mxu1 }
 0x196   : > { %v1996_v19 = vpack.c.bf16 %v1456_v14, %v1455_v13  ;;  %v2238_v20 = vadd.f32 %v2237_v18, %v2236_v12  ;;  %v2127_v21 = vpop.f32.mrf.mxu0  ;;  %v1425_v23 = vadd.f32 %v2869_v42, %v1265_v15 }
 0x197   : > { %v2239_v22 = vpop.f32.mrf.mxu1 }
 0x198   : > { %2028 = vst [vmem:[%s2874_s22 + $0x58] sm:$0xff] %v1996_v19   ;;  %v1268_v24 = vadd.f32 %v2238_v20, %v2126_v17  ;;  %v2128_v25 = vpop.f32.mrf.mxu0  ;;  %v1457_v32 = vmax.f32 %v1425_v23, 0.0 }
 0x199   : > { %v2129_v26 = vadd.f32 %v2128_v25, %v2127_v21  ;;  %v2240_v27 = vpop.f32.mrf.mxu1 }
 0x19a   : > { %v1426_v28 = vadd.f32 %v2869_v42, %v1268_v24  ;;  %v2241_v29 = vadd.f32 %v2240_v27, %v2239_v22  ;;  %v2130_v30 = vpop.f32.mrf.mxu0 }
 0x19b   : > { %v2242_v31 = vpop.f32.mrf.mxu1 }
 0x19c   : > { %v1458_v33 = vmax.f32 %v1426_v28, 0.0  ;;  %v1273_v34 = vadd.f32 %v2241_v29, %v2129_v26  ;;  %v2131_v35 = vpop.f32.mrf.mxu0 }
 0x19d   : > { %v2132_v36 = vadd.f32 %v2131_v35, %v2130_v30  ;;  %v2243_v37 = vpop.f32.mrf.mxu1 }
 0x19e   : > { %v2001_v38 = vpack.c.bf16 %v1458_v33, %v1457_v32  ;;  %v2244_v39 = vadd.f32 %v2243_v37, %v2242_v31  ;;  %v2133_v40 = vpop.f32.mrf.mxu0  ;;  %v1427_v43 = vadd.f32 %v2869_v42, %v1273_v34 }
 0x19f   : > { %v2245_v41 = vpop.f32.mrf.mxu1 }
 0x1a0   : > { %2029 = vst [vmem:[%s2874_s22 + $0x60] sm:$0xff] %v2001_v38   ;;  %v1276_v44 = vadd.f32 %v2244_v39, %v2132_v36  ;;  %v2134_v45 = vpop.f32.mrf.mxu0  ;;  %v1459_v52 = vmax.f32 %v1427_v43, 0.0 }
 0x1a1   : > { %v2135_v46 = vadd.f32 %v2134_v45, %v2133_v40  ;;  %v2246_v47 = vpop.f32.mrf.mxu1 }
 0x1a2   : > { %v1428_v48 = vadd.f32 %v2869_v42, %v1276_v44  ;;  %v2247_v49 = vadd.f32 %v2246_v47, %v2245_v41  ;;  %v2136_v50 = vpop.f32.mrf.mxu0 }
 0x1a3   : > { %v2248_v51 = vpop.f32.mrf.mxu1 }
 0x1a4   : > { %v1460_v53 = vmax.f32 %v1428_v48, 0.0  ;;  %v1281_v54 = vadd.f32 %v2247_v49, %v2135_v46  ;;  %v2137_v55 = vpop.f32.mrf.mxu0 }
 0x1a5   : > { %v2138_v56 = vadd.f32 %v2137_v55, %v2136_v50  ;;  %v2249_v57 = vpop.f32.mrf.mxu1 }
 0x1a6   : > { %v2006_v58 = vpack.c.bf16 %v1460_v53, %v1459_v52  ;;  %v2250_v59 = vadd.f32 %v2249_v57, %v2248_v51  ;;  %v2139_v60 = vpop.f32.mrf.mxu0  ;;  %v1429_v62 = vadd.f32 %v2869_v42, %v1281_v54 }
 0x1a7   : > { %v2251_v61 = vpop.f32.mrf.mxu1 }
 0x1a8   : > { %2030 = vst [vmem:[%s2874_s22 + $0x68] sm:$0xff] %v2006_v58   ;;  %v1284_v63 = vadd.f32 %v2250_v59, %v2138_v56  ;;  %v2140_v0 = vpop.f32.mrf.mxu0  ;;  %v1461_v7 = vmax.f32 %v1429_v62, 0.0 }
 0x1a9   : > { %v2141_v1 = vadd.f32 %v2140_v0, %v2139_v60  ;;  %v2252_v2 = vpop.f32.mrf.mxu1 }
 0x1aa   : > { %v1430_v3 = vadd.f32 %v2869_v42, %v1284_v63  ;;  %v2253_v4 = vadd.f32 %v2252_v2, %v2251_v61  ;;  %v2142_v5 = vpop.f32.mrf.mxu0 }
 0x1ab   : > { %v2254_v6 = vpop.f32.mrf.mxu1 }
 0x1ac   : > { %v1462_v8 = vmax.f32 %v1430_v3, 0.0  ;;  %v1289_v9 = vadd.f32 %v2253_v4, %v2141_v1  ;;  %v2143_v10 = vpop.f32.mrf.mxu0 }
 0x1ad   : > { %v2144_v11 = vadd.f32 %v2143_v10, %v2142_v5  ;;  %v2255_v12 = vpop.f32.mrf.mxu1 }
 0x1ae   : > { %v2011_v13 = vpack.c.bf16 %v1462_v8, %v1461_v7  ;;  %v2256_v14 = vadd.f32 %v2255_v12, %v2254_v6  ;;  %v1431_v15 = vadd.f32 %v2869_v42, %v1289_v9 }
 0x1b0   : > { %2031 = vst [vmem:[%s2874_s22 + $0x70] sm:$0xff] %v2011_v13   ;;  %v1292_v16 = vadd.f32 %v2256_v14, %v2144_v11  ;;  %v1463_v18 = vmax.f32 %v1431_v15, 0.0 }
 0x1b2   : > { %v1432_v17 = vadd.f32 %v2869_v42, %v1292_v16 }
 0x1b4   : > { %v1464_v19 = vmax.f32 %v1432_v17, 0.0 }
 0x1b6   : > { %v2016_v20 = vpack.c.bf16 %v1464_v19, %v1463_v18 }
 0x1b8   : > { %2032 = vst [vmem:[%s2874_s22 + $0x78] sm:$0xff] %v2016_v20  }
 0x1b9   : > { %2567 = shalt.err (!%p2564_p0)
}
 0x1ba   : > { %s2568_s28 = scalar_lea.hbm %s2926_s9, 2048  ;;  %s2572_s5 = scalar_lea.hbm %s2979_s3, 16384 }
 0x1bb   : > { %p2569_p5 = scmp.ne.s32.totalorder %s2926_s9, %s2568_s28  ;;  %p2573_p11 = scmp.lt.s32.totalorder %s2926_s9, %s2979_s3 }
 0x1bc   : > { %p2574_p7 = scmp.lt.s32.totalorder %s2572_s5, %s2568_s28 }
 0x1bd   : > { %p2570_p1 = pnand %p2569_p5, %p2764_p12 }
 0x1be   : > { %p2575_p9 = por %p2574_p7, %p2573_p11 }
 0x1bf   : > { %p2571_p6 = pneg %p2570_p1 }
 0x1c1   : > { %p2576_p4 = pnand %p2575_p9, %p2571_p6 }
 0x1c3   : > { %2579 = shalt.err (!%p2576_p4)
}
 0x1c4   : > { %s2648_s22 = smov 64   ;;  %s2649_s24 = smov 4  }
 0x1c5   : > { %2267 = dma.vmem_to_hbm [thread:$0]  (%p2764_p12), %s2928_s6, 2048, %s2926_s9, %s1626_s10, %s2648_s22, %s2648_s22, %s2649_s24  }
 0x1c6 PF: > { %p2289_p8 = scmp.ge.s32.totalorder %s2638_s17, 2  ;;  %s1655_s8 = sand.u32 1, %s2618_s12  }
 0x1c7   : > { %p2991_p13 = scmp.ne.s32.totalorder %s2985_s23, 0  ;;  %s1656_s21 = scalar_lea.sflag [#allocation5], %s1655_s8 }
 0x1c9   : > { %p2281_p10 = pnand %p2289_p8, %p2991_p13 }
 0x1cb   : > { %p2282_p2 = pneg %p2281_p10 }
 0x1cd   : > { %2613 = dma.done.wait (%p2282_p2), %s1656_s21, 2048  }
 0x1ce   : > { %2615 = vsyncadd (%p2282_p2), %s1656_s21, 4294965248  ;;  %s20_s17 = sadd.s32 1, %s2638_s17   ;;  %s2992_s12 = smov %s2622_s13 }
 0x1cf   : > { %p17_p3 = scmp.ge.s32.totalorder %s20_s17, 10   ;;  %s2993_s13 = smov %s2626_s14 }
 0x1d0   : > { %s2994_s14 = smov %s2773_s30  ;;  %s2995_s15 = smov %s2634_s16 }
 0x1d1   : > { %s2996_s16 = smov %s2998_s18  ;;  %19 = sbr.rel (!%p17_p3) target bundleno = 7 (0x7), region = 95 }
 0x1d6   :  { %1661 = vsyncpa [#allocation4], 1 }
 0x1d7   :  { %1663 = vsyncpa [#allocation4 + $0x1], 1 }
 0x1d8   :  { %1664 = vsyncpa [#allocation7], 1 }
 0x1d9   :  { %1665 = vsyncpa [#allocation5], 1 }
 0x1da   :  { %1667 = vsyncpa [#allocation5 + $0x1], 1 }

</bundles_post_ra>
